<compile_context>
chip_gen: v7x
topology: tpu7x:2x2x1
jax: 0.10.0
libtpu: 0.0.40
codegen_flags: <defaults>
</compile_context>

<pallas_src>
import functools

import jax
import jax.numpy as jnp
from jax.experimental import pallas as pl
from jax.experimental.pallas import tpu as pltpu

HIDDEN = 768          # ViT hidden size expected by the classifier head
MLP_HIDDEN = 512
NUM_CLASSES = 2
PAD_CLASSES = 128     # lane-dense padded logit width (sliced back to NUM_CLASSES)
DROP_P = 0.3
LN_EPS = 1e-6


def _i32(x):
    """Python int -> value representable as int32 (two's complement)."""
    x &= 0xFFFFFFFF
    return x - (1 << 32) if x >= (1 << 31) else x


_FMIX_C1 = _i32(0x85EBCA6B)
_FMIX_C2 = _i32(0xC2B2AE35)


def _srl(x, n):
    """Logical right shift of int32 bit patterns (arithmetic shift + mask)."""
    return (x >> n) & jnp.int32((1 << (32 - n)) - 1)


def _round_up(x, m):
    return (x + m - 1) // m * m


# ----------------------------- Pallas kernel ------------------------------- #
def _head_kernel(seed_ref, x_ref, ln_g_ref, ln_b_ref,
                 w1_ref, b1_ref, w2_ref, b2_ref, o_ref, *, training):
    # x:  [tm, 768] f32 (pre-LN cls tokens)
    # w1: [768, 512] bf16   b1: [1, 512] f32
    # w2: [512, 128] bf16 (zero-padded past NUM_CLASSES)   b2: [1, 128] f32
    x = x_ref[...]

    # Fused encoder-final LayerNorm (per-token, so LN(seq)[:, 0] == LN(seq[:, 0])).
    mu = jnp.mean(x, axis=-1, keepdims=True)
    var = jnp.mean(jnp.square(x - mu), axis=-1, keepdims=True)
    xn = (x - mu) * jax.lax.rsqrt(var + LN_EPS) * ln_g_ref[...] + ln_b_ref[...]

    # Linear(768 -> 512): bf16 MXU inputs, f32 accumulation.
    h = jnp.dot(xn.astype(jnp.bfloat16), w1_ref[...],
                preferred_element_type=jnp.float32) + b1_ref[...]
    h = jnp.maximum(h, 0.0)                                   # ReLU

    if training:
        # Dropout(0.3) via a counter-based fmix32 hash: portable (Mosaic and
        # interpret mode), distinct mask per grid step via program_id mixing.
        rows, cols = h.shape
        base = seed_ref[0] + pl.program_id(0) * jnp.int32(rows * cols)
        r = jax.lax.broadcasted_iota(jnp.int32, h.shape, 0)
        c = jax.lax.broadcasted_iota(jnp.int32, h.shape, 1)
        z = base + r * jnp.int32(cols) + c
        z = (z ^ _srl(z, 16)) * jnp.int32(_FMIX_C1)
        z = (z ^ _srl(z, 13)) * jnp.int32(_FMIX_C2)
        z = z ^ _srl(z, 16)
        u = _srl(z, 8).astype(jnp.float32) * jnp.float32(1.0 / (1 << 24))  # [0,1)
        keep = u < jnp.float32(1.0 - DROP_P)
        h = jnp.where(keep, h * jnp.float32(1.0 / (1.0 - DROP_P)), 0.0)

    # Linear(512 -> 128 padded): lane-dense output tile (sliced outside).
    o_ref[...] = jnp.dot(h.astype(jnp.bfloat16), w2_ref[...],
                         preferred_element_type=jnp.float32) + b2_ref[...]


def classifier_head(cls_pre_ln, params, seed, *, training=False):
    """cls_pre_ln: [B, 768] f32 (pre-LN cls features) -> logits [B, NUM_CLASSES] f32."""
    B = cls_pre_ln.shape[0]
    tm = min(256, _round_up(B, 8))          # batch tile: multiple of 8 sublanes
    Bp = _round_up(B, tm)
    x = cls_pre_ln
    if Bp != B:
        x = jnp.pad(x, ((0, Bp - B), (0, 0)))

    kernel = functools.partial(_head_kernel, training=training)
    grid_spec = pltpu.PrefetchScalarGridSpec(
        num_scalar_prefetch=1,               # dropout seed lives in SMEM
        grid=(Bp // tm,),
        in_specs=[
            pl.BlockSpec((tm, HIDDEN), lambda i, s: (i, 0)),               # x tile
            pl.BlockSpec((1, HIDDEN), lambda i, s: (0, 0)),                # ln_g
            pl.BlockSpec((1, HIDDEN), lambda i, s: (0, 0)),                # ln_b
            pl.BlockSpec((HIDDEN, MLP_HIDDEN), lambda i, s: (0, 0)),       # w1 (resident)
            pl.BlockSpec((1, MLP_HIDDEN), lambda i, s: (0, 0)),            # b1
            pl.BlockSpec((MLP_HIDDEN, PAD_CLASSES), lambda i, s: (0, 0)),  # w2 (resident)
            pl.BlockSpec((1, PAD_CLASSES), lambda i, s: (0, 0)),           # b2
        ],
        out_specs=pl.BlockSpec((tm, PAD_CLASSES), lambda i, s: (i, 0)),
    )
    out = pl.pallas_call(
        kernel,
        out_shape=jax.ShapeDtypeStruct((Bp, PAD_CLASSES), jnp.float32),
        grid_spec=grid_spec,
        compiler_params=pltpu.CompilerParams(
            dimension_semantics=("parallel",),   # independent batch tiles (v7x: 2 TCs)
        ),
    )(seed, x, params["ln_g"], params["ln_b"],
      params["w1"], params["b1"], params["w2"], params["b2"])
    return out[:B, :NUM_CLASSES]


# ----------------------- synthetic frozen ViT encoder ---------------------- #
def synthetic_vit_encoder(x, params):
    # TODO(synk): the real pretrained ViT encoder is an opaque, frozen external
    # nn.Module; it is replaced by a deterministic patch-embed + cls-token +
    # pos-embed stand-in (plain-JAX glue). Its final LayerNorm is fused, exactly,
    # into the Pallas classifier kernel (LayerNorm is per-token).
    B, C, H, W = x.shape
    P = params["patch"]
    nh, nw = H // P, W // P
    patches = (
        x.reshape(B, C, nh, P, nw, P)
         .transpose(0, 2, 4, 1, 3, 5)
         .reshape(B, nh * nw, C * P * P)
    )
    tok = patches @ params["w_patch"] + params["b_patch"]            # [B, N, 768]
    cls = jnp.broadcast_to(params["cls_token"], (B, 1, HIDDEN))
    return jnp.concatenate([cls, tok], axis=1) + params["pos_embed"]  # pre-LN


def init_params(key, C, P, num_patches):
    ks = jax.random.split(key, 7)
    patch_dim = C * P * P
    w2 = jnp.zeros((MLP_HIDDEN, PAD_CLASSES), jnp.float32)
    w2 = w2.at[:, :NUM_CLASSES].set(
        0.02 * jax.random.normal(ks[4], (MLP_HIDDEN, NUM_CLASSES), jnp.float32))
    b2 = jnp.zeros((1, PAD_CLASSES), jnp.float32)
    b2 = b2.at[:, :NUM_CLASSES].set(
        0.02 * jax.random.normal(ks[5], (1, NUM_CLASSES), jnp.float32))
    return {
        "patch": P,
        "w_patch": 0.02 * jax.random.normal(ks[0], (patch_dim, HIDDEN), jnp.float32),
        "b_patch": jnp.zeros((HIDDEN,), jnp.float32),
        "cls_token": 0.02 * jax.random.normal(ks[1], (1, 1, HIDDEN), jnp.float32),
        "pos_embed": 0.02 * jax.random.normal(
            ks[2], (1, num_patches + 1, HIDDEN), jnp.float32),
        "ln_g": jnp.ones((1, HIDDEN), jnp.float32),
        "ln_b": jnp.zeros((1, HIDDEN), jnp.float32),
        # Classifier head (the trainable part of ViTClassifier). Weights are
        # stored in bf16 (native MXU input; halves the weight DMA), biases f32.
        "w1": (0.02 * jax.random.normal(ks[3], (HIDDEN, MLP_HIDDEN), jnp.float32)
               ).astype(jnp.bfloat16),
        "b1": 0.02 * jax.random.normal(ks[6], (1, MLP_HIDDEN), jnp.float32),
        "w2": w2.astype(jnp.bfloat16),      # [512, 128] zero-padded, lane-dense
        "b2": b2,                           # [1, 128] f32, zero-padded
    }


def vit_classifier_forward(x, params, seed, *, training=False):
    features = synthetic_vit_encoder(x, params)     # encoder(x) -> [B, seq, 768]
    cls_token = features[:, 0, :]                   # features[:, 0, :]
    return classifier_head(cls_token, params, seed, training=training)


# ---------------------------------- main ----------------------------------- #
if __name__ == "__main__":
    key = jax.random.PRNGKey(0)
    k_x, k_p = jax.random.split(key)

    B, C, H, W, P = 2, 3, 32, 32, 16                # 4 patches + cls -> seq = 5
    x = jax.random.normal(k_x, (B, C, H, W), jnp.float32)
    params = init_params(k_p, C, P, num_patches=(H // P) * (W // P))
    seed = jnp.array([0], dtype=jnp.int32)

    # eval-mode (dropout = identity) — deterministic, check against plain JAX
    logits_eval = vit_classifier_forward(x, params, seed, training=False)
    # train-mode — exercises the in-kernel hash-based dropout path
    logits_train = vit_classifier_forward(x, params, seed, training=True)
    jax.block_until_ready((logits_eval, logits_train))

    # plain-JAX reference with matching bf16 casts
    feats = synthetic_vit_encoder(x, params)
    cls = feats[:, 0, :]
    mu = cls.mean(-1, keepdims=True)
    var = ((cls - mu) ** 2).mean(-1, keepdims=True)
    ln = (cls - mu) * jax.lax.rsqrt(var + LN_EPS) * params["ln_g"] + params["ln_b"]
    h_ref = jnp.maximum(
        jnp.dot(ln.astype(jnp.bfloat16), params["w1"],
                preferred_element_type=jnp.float32) + params["b1"], 0.0)
    ref = (jnp.dot(h_ref.astype(jnp.bfloat16), params["w2"],
                   preferred_element_type=jnp.float32) + params["b2"])[:, :NUM_CLASSES]

    assert logits_eval.shape == (B, NUM_CLASSES)
    assert logits_train.shape == (B, NUM_CLASSES)
    assert bool(jnp.all(jnp.isfinite(logits_train)))
    assert jnp.allclose(logits_eval, ref, atol=1e-2, rtol=1e-2)

    print("KERNEL_OK")
</pallas_src>

<mosaic_0001>
module attributes {stable_mosaic.version = 11 : i64} {
  func.func @_head_kernel(%arg0: i32, %arg1: memref<1xi32, #tpu.memory_space<smem>>, %arg2: memref<8x768xf32, #tpu.memory_space<vmem>>, %arg3: memref<1x768xf32, #tpu.memory_space<vmem>>, %arg4: memref<1x768xf32, #tpu.memory_space<vmem>>, %arg5: memref<768x512xbf16, #tpu.memory_space<vmem>>, %arg6: memref<1x512xf32, #tpu.memory_space<vmem>>, %arg7: memref<512x128xbf16, #tpu.memory_space<vmem>>, %arg8: memref<1x128xf32, #tpu.memory_space<vmem>>, %arg9: memref<8x128xf32, #tpu.memory_space<vmem>>) attributes {dimension_semantics = [#tpu.dimension_semantics<parallel>], iteration_bounds = array<i64: 1>, scalar_prefetch = 1 : i64, scratch_operands = 0 : i64, tpu.core_type = #tpu.core_type<tc>, window_params = [{transform_indices = @transform_0, window_bounds = array<i64: 8, 768>}, {pipeline_mode = #tpu.pipeline_mode<synchronous>, transform_indices = @transform_1, window_bounds = array<i64: 1, 768>}, {pipeline_mode = #tpu.pipeline_mode<synchronous>, transform_indices = @transform_2, window_bounds = array<i64: 1, 768>}, {pipeline_mode = #tpu.pipeline_mode<synchronous>, transform_indices = @transform_3, window_bounds = array<i64: 768, 512>}, {pipeline_mode = #tpu.pipeline_mode<synchronous>, transform_indices = @transform_4, window_bounds = array<i64: 1, 512>}, {pipeline_mode = #tpu.pipeline_mode<synchronous>, transform_indices = @transform_5, window_bounds = array<i64: 512, 128>}, {pipeline_mode = #tpu.pipeline_mode<synchronous>, transform_indices = @transform_6, window_bounds = array<i64: 1, 128>}, {transform_indices = @transform_7, window_bounds = array<i64: 8, 128>}]} {
    %c0 = arith.constant 0 : index
    %c0_0 = arith.constant 0 : index
    %0 = vector.load %arg2[%c0, %c0_0] : memref<8x768xf32, #tpu.memory_space<vmem>>, vector<8x768xf32>
    %cst = arith.constant dense<0.000000e+00> : vector<8xf32>
    %1 = vector.multi_reduction <add>, %0, %cst [1] : vector<8x768xf32> to vector<8xf32>
    %2 = vector.shape_cast %1 : vector<8xf32> to vector<8x1xf32>
    %cst_1 = arith.constant 7.680000e+02 : f32
    %3 = vector.broadcast %cst_1 : f32 to vector<8x1xf32>
    %4 = arith.divf %2, %3 : vector<8x1xf32>
    %5 = vector.broadcast %4 : vector<8x1xf32> to vector<8x768xf32>
    %6 = arith.subf %0, %5 : vector<8x768xf32>
    %7 = arith.mulf %6, %6 : vector<8x768xf32>
    %cst_2 = arith.constant dense<0.000000e+00> : vector<8xf32>
    %8 = vector.multi_reduction <add>, %7, %cst_2 [1] : vector<8x768xf32> to vector<8xf32>
    %9 = vector.shape_cast %8 : vector<8xf32> to vector<8x1xf32>
    %cst_3 = arith.constant 7.680000e+02 : f32
    %10 = vector.broadcast %cst_3 : f32 to vector<8x1xf32>
    %11 = arith.divf %9, %10 : vector<8x1xf32>
    %12 = vector.broadcast %4 : vector<8x1xf32> to vector<8x768xf32>
    %13 = arith.subf %0, %12 : vector<8x768xf32>
    %cst_4 = arith.constant 9.99999997E-7 : f32
    %14 = vector.broadcast %cst_4 : f32 to vector<8x1xf32>
    %15 = arith.addf %11, %14 : vector<8x1xf32>
    %16 = math.rsqrt %15 : vector<8x1xf32>
    %17 = vector.broadcast %16 : vector<8x1xf32> to vector<8x768xf32>
    %18 = arith.mulf %13, %17 : vector<8x768xf32>
    %c0_5 = arith.constant 0 : index
    %c0_6 = arith.constant 0 : index
    %19 = vector.load %arg3[%c0_5, %c0_6] : memref<1x768xf32, #tpu.memory_space<vmem>>, vector<1x768xf32>
    %20 = vector.broadcast %19 : vector<1x768xf32> to vector<8x768xf32>
    %21 = arith.mulf %18, %20 : vector<8x768xf32>
    %c0_7 = arith.constant 0 : index
    %c0_8 = arith.constant 0 : index
    %22 = vector.load %arg4[%c0_7, %c0_8] : memref<1x768xf32, #tpu.memory_space<vmem>>, vector<1x768xf32>
    %23 = vector.broadcast %22 : vector<1x768xf32> to vector<8x768xf32>
    %24 = arith.addf %21, %23 : vector<8x768xf32>
    %25 = arith.truncf %24 : vector<8x768xf32> to vector<8x768xbf16>
    %c0_9 = arith.constant 0 : index
    %c0_10 = arith.constant 0 : index
    %26 = vector.load %arg5[%c0_9, %c0_10] : memref<768x512xbf16, #tpu.memory_space<vmem>>, vector<768x512xbf16>
    %cst_11 = arith.constant dense<0.000000e+00> : vector<8x512xf32>
    %27 = tpu.matmul %25, %26, %cst_11 {dimension_numbers = #tpu.dot_dimension_numbers<[1], [0], [0], [1], [0, 0, 1, 1], [], []>} : vector<8x768xbf16>, vector<768x512xbf16>, vector<8x512xf32> -> vector<8x512xf32>
    %c0_12 = arith.constant 0 : index
    %c0_13 = arith.constant 0 : index
    %28 = vector.load %arg6[%c0_12, %c0_13] : memref<1x512xf32, #tpu.memory_space<vmem>>, vector<1x512xf32>
    %29 = vector.broadcast %28 : vector<1x512xf32> to vector<8x512xf32>
    %30 = arith.addf %27, %29 : vector<8x512xf32>
    %cst_14 = arith.constant 0.000000e+00 : f32
    %31 = vector.broadcast %cst_14 : f32 to vector<8x512xf32>
    %32 = arith.maximumf %30, %31 : vector<8x512xf32>
    %33 = arith.truncf %32 : vector<8x512xf32> to vector<8x512xbf16>
    %c0_15 = arith.constant 0 : index
    %c0_16 = arith.constant 0 : index
    %34 = vector.load %arg7[%c0_15, %c0_16] : memref<512x128xbf16, #tpu.memory_space<vmem>>, vector<512x128xbf16>
    %cst_17 = arith.constant dense<0.000000e+00> : vector<8x128xf32>
    %35 = tpu.matmul %33, %34, %cst_17 {dimension_numbers = #tpu.dot_dimension_numbers<[1], [0], [0], [1], [0, 0, 1, 1], [], []>} : vector<8x512xbf16>, vector<512x128xbf16>, vector<8x128xf32> -> vector<8x128xf32>
    %c0_18 = arith.constant 0 : index
    %c0_19 = arith.constant 0 : index
    %36 = vector.load %arg8[%c0_18, %c0_19] : memref<1x128xf32, #tpu.memory_space<vmem>>, vector<1x128xf32>
    %37 = vector.broadcast %36 : vector<1x128xf32> to vector<8x128xf32>
    %38 = arith.addf %35, %37 : vector<8x128xf32>
    %c0_20 = arith.constant 0 : index
    %c0_21 = arith.constant 0 : index
    %39 = vector.load %arg9[%c0_20, %c0_21] : memref<8x128xf32, #tpu.memory_space<vmem>>, vector<8x128xf32>
    tpu.vector_store %arg9[%c0_20, %c0_21], %38 {strides = array<i32>} : memref<8x128xf32, #tpu.memory_space<vmem>>, vector<8x128xf32>,
    return
  }
  func.func @transform_0(%arg0: i32, %arg1: memref<1xi32, #tpu.memory_space<smem>>) -> (i32, i32) {
    %c0_i32 = arith.constant 0 : i32
    %c0_i32_0 = arith.constant 0 : i32
    return %arg0, %c0_i32 : i32, i32
  }
  func.func @transform_1(%arg0: i32, %arg1: memref<1xi32, #tpu.memory_space<smem>>) -> (i32, i32) {
    %c0_i32 = arith.constant 0 : i32
    %c0_i32_0 = arith.constant 0 : i32
    %c0_i32_1 = arith.constant 0 : i32
    return %c0_i32, %c0_i32_0 : i32, i32
  }
  func.func @transform_2(%arg0: i32, %arg1: memref<1xi32, #tpu.memory_space<smem>>) -> (i32, i32) {
    %c0_i32 = arith.constant 0 : i32
    %c0_i32_0 = arith.constant 0 : i32
    %c0_i32_1 = arith.constant 0 : i32
    return %c0_i32, %c0_i32_0 : i32, i32
  }
  func.func @transform_3(%arg0: i32, %arg1: memref<1xi32, #tpu.memory_space<smem>>) -> (i32, i32) {
    %c0_i32 = arith.constant 0 : i32
    %c0_i32_0 = arith.constant 0 : i32
    %c0_i32_1 = arith.constant 0 : i32
    return %c0_i32, %c0_i32_0 : i32, i32
  }
  func.func @transform_4(%arg0: i32, %arg1: memref<1xi32, #tpu.memory_space<smem>>) -> (i32, i32) {
    %c0_i32 = arith.constant 0 : i32
    %c0_i32_0 = arith.constant 0 : i32
    %c0_i32_1 = arith.constant 0 : i32
    return %c0_i32, %c0_i32_0 : i32, i32
  }
  func.func @transform_5(%arg0: i32, %arg1: memref<1xi32, #tpu.memory_space<smem>>) -> (i32, i32) {
    %c0_i32 = arith.constant 0 : i32
    %c0_i32_0 = arith.constant 0 : i32
    %c0_i32_1 = arith.constant 0 : i32
    return %c0_i32, %c0_i32_0 : i32, i32
  }
  func.func @transform_6(%arg0: i32, %arg1: memref<1xi32, #tpu.memory_space<smem>>) -> (i32, i32) {
    %c0_i32 = arith.constant 0 : i32
    %c0_i32_0 = arith.constant 0 : i32
    %c0_i32_1 = arith.constant 0 : i32
    return %c0_i32, %c0_i32_0 : i32, i32
  }
  func.func @transform_7(%arg0: i32, %arg1: memref<1xi32, #tpu.memory_space<smem>>) -> (i32, i32) {
    %c0_i32 = arith.constant 0 : i32
    %c0_i32_0 = arith.constant 0 : i32
    return %arg0, %c0_i32 : i32, i32
  }
}

</mosaic_0001>

<bundles_post_ra>
// kernel: tpu_custom_call.1
= control target key start
LH: loop header
LB: loop body
LE: loop exit
PB: predicated region body
PF: predicated region fallthrough
CT: control target
= control target key end

     0   :  { %14 = vsyncpa [#allocation5], 0  ;;  %s2942_s0 = inlined_call_operand.<no memory space> [shape: s32[1], index: 0, kind: input, shape index: {}]   ;;  %s2943_s1 = inlined_call_operand.hbm [shape: f32[8,768], index: 1, kind: input, shape index: {}]   ;;  %s2944_s2 = inlined_call_operand.vmem [shape: f32[1,768], index: 2, kind: input, shape index: {}]   ;;  %s2945_s3 = inlined_call_operand.hbm [shape: f32[1,768], index: 3, kind: input, shape index: {}]   ;;  %s2946_s4 = inlined_call_operand.hbm [shape: bf16[768,512], index: 4, kind: input, shape index: {}]   ;;  %s2947_s5 = inlined_call_operand.vmem [shape: f32[1,512], index: 5, kind: input, shape index: {}]   ;;  %s2948_s6 = inlined_call_operand.hbm [shape: bf16[512,128], index: 6, kind: input, shape index: {}]   ;;  %s2949_s7 = inlined_call_operand.vmem [shape: f32[1,128], index: 7, kind: input, shape index: {}]   ;;  %s2950_s8 = inlined_call_operand.hbm [shape: f32[8,128], index: 8, kind: output, shape index: {}]  }
   0x1   :  { %15 = vsyncpa [#allocation8], 0 }
   0x2   :  { %16 = vsyncpa [#allocation11], 0 }
   0x3   :  { %17 = vsyncpa [#allocation6], 0  ;;  %s2733_s26 = smov [#allocation7]   ;;  %s2734_s28 = smov [#allocation4]  }
   0x4   :  { %s36_s27 = sshll.u32 %s2733_s26, 4  ;;  %s24_s29 = sshll.u32 %s2734_s28, 4  ;;  %s37_s27 = int_to_ptr.vmem [resolvable:$true] %s36_s27  ;;  %s25_s29 = int_to_ptr.vmem [resolvable:$true] %s24_s29 }
   0x5   :  { %s2615_s10 = scalar_lea.hbm %s2945_s3, 96 }
   0x6   :  { %p2616_p0 = scmp.ne.s32.totalorder %s2945_s3, %s2615_s10  ;;  %p2619_p1 = scmp.lt.u32.totalorder %s2615_s10, %s2945_s3 }
   0x8   :  { %p2621_p2 = pnand %p2619_p1, %p2616_p0 }
   0xa   :  { %2624 = shalt.err (!%p2621_p2)
}
   0xb   :  { %s2625_s15 = scalar_lea.vmem %s37_s27, 96  ;;  %p2630_p4 = scmp.lt.s32.totalorder %s37_s27, %s37_s27 }
   0xc   :  { %p2626_p3 = scmp.ne.s32.totalorder %s37_s27, %s2625_s15  ;;  %p2631_p5 = scmp.lt.s32.totalorder %s2625_s15, %s2625_s15 }
   0xe   :  { %p2632_p6 = por %p2631_p5, %p2630_p4 }
  0x10   :  { %p2633_p7 = pnand %p2632_p6, %p2626_p3 }
  0x12   :  { %2636 = shalt.err (!%p2633_p7)
}
  0x13   :  { %39 = dma.hbm_to_vmem [thread:$0]  %s2945_s3, 96, %s37_s27, [#allocation8]  }
  0x14   :  { %s2637_s20 = scalar_lea.hbm %s2943_s1, 768 }
  0x15   :  { %p2638_p8 = scmp.ne.s32.totalorder %s2943_s1, %s2637_s20  ;;  %p2641_p9 = scmp.lt.u32.totalorder %s2637_s20, %s2943_s1 }
  0x17   :  { %p2643_p10 = pnand %p2641_p9, %p2638_p8 }
  0x19   :  { %2646 = shalt.err (!%p2643_p10)
}
  0x1a   :  { %s2647_s24 = scalar_lea.vmem %s25_s29, 768  ;;  %p2652_p12 = scmp.lt.s32.totalorder %s25_s29, %s25_s29 }
  0x1b   :  { %p2648_p11 = scmp.ne.s32.totalorder %s25_s29, %s2647_s24  ;;  %p2653_p13 = scmp.lt.s32.totalorder %s2647_s24, %s2647_s24 }
  0x1d   :  { %p2654_p0 = por %p2653_p13, %p2652_p12 }
  0x1f   :  { %p2655_p1 = pnand %p2654_p0, %p2648_p11 }
  0x21   :  { %2658 = shalt.err (!%p2655_p1)
}
  0x22   :  { %27 = dma.hbm_to_vmem [thread:$0]  %s2943_s1, 768, %s25_s29, [#allocation5]  }
  0x23   :  { %s2735_s26 = smov [#allocation9]   ;;  %s2659_s9 = scalar_lea.hbm %s2946_s4, 24576 }
  0x24   :  { %s45_s27 = sshll.u32 %s2735_s26, 4  ;;  %p2660_p2 = scmp.ne.s32.totalorder %s2946_s4, %s2659_s9  ;;  %s46_s27 = int_to_ptr.vmem [resolvable:$true] %s45_s27 }
  0x25   :  { %p2663_p3 = scmp.lt.u32.totalorder %s2659_s9, %s2946_s4 }
  0x27   :  { %p2665_p4 = pnand %p2663_p3, %p2660_p2 }
  0x29   :  { %2668 = shalt.err (!%p2665_p4)
}
  0x2a   :  { %s2669_s14 = scalar_lea.vmem %s46_s27, 24576  ;;  %p2674_p6 = scmp.lt.s32.totalorder %s46_s27, %s46_s27 }
  0x2b   :  { %p2670_p5 = scmp.ne.s32.totalorder %s46_s27, %s2669_s14  ;;  %p2675_p7 = scmp.lt.s32.totalorder %s2669_s14, %s2669_s14 }
  0x2d   :  { %p2676_p8 = por %p2675_p7, %p2674_p6 }
  0x2f   :  { %p2677_p9 = pnand %p2676_p8, %p2670_p5 }
  0x31   :  { %2680 = shalt.err (!%p2677_p9)
}
  0x32   :  { %s2736_s1 = smov 256   ;;  %s2737_s29 = smov 16  }
  0x33   :  { %51 = dma.hbm_to_vmem [thread:$0]  %s2946_s4, 24576, %s46_s27, [#allocation8], %s2736_s1, %s2736_s1, %s2737_s29  }
  0x34   :  { %s2738_s17 = smov [#allocation10]   ;;  %s2681_s21 = scalar_lea.hbm %s2948_s6, 4096 }
  0x35   :  { %s59_s18 = sshll.u32 %s2738_s17, 4  ;;  %p2682_p10 = scmp.ne.s32.totalorder %s2948_s6, %s2681_s21  ;;  %s60_s18 = int_to_ptr.vmem [resolvable:$true] %s59_s18 }
  0x36   :  { %p2685_p11 = scmp.lt.u32.totalorder %s2681_s21, %s2948_s6 }
  0x38   :  { %p2687_p12 = pnand %p2685_p11, %p2682_p10 }
  0x3a   :  { %2690 = shalt.err (!%p2687_p12)
}
  0x3b   :  { %s2691_s3 = scalar_lea.vmem %s60_s18, 4096  ;;  %p2696_p0 = scmp.lt.s32.totalorder %s60_s18, %s60_s18 }
  0x3c   :  { %p2692_p13 = scmp.ne.s32.totalorder %s60_s18, %s2691_s3  ;;  %p2697_p1 = scmp.lt.s32.totalorder %s2691_s3, %s2691_s3 }
  0x3e   :  { %p2698_p2 = por %p2697_p1, %p2696_p0 }
  0x40   :  { %p2699_p3 = pnand %p2698_p2, %p2692_p13 }
  0x42   :  { %2702 = shalt.err (!%p2699_p3)
}
  0x43   :  { %s2739_s4 = smov 64   ;;  %s2740_s25 = smov 4  }
  0x44   :  { %65 = dma.hbm_to_vmem [thread:$0]  %s2948_s6, 4096, %s60_s18, [#allocation11], %s2739_s4, %s2739_s4, %s2740_s25  }
  0x45   :  { %2725 = dma.done.wait [#allocation5], 768  }
  0x46   :  { %2726 = vsyncadd [#allocation5], 4294966528 }
  0x47   :  { %2727 = dma.done.wait [#allocation8], 24672  }
  0x48   :  { %2728 = vsyncadd [#allocation8], 4294942624 }
  0x49   :  { %2729 = dma.done.wait [#allocation11], 4096  }
  0x4a   :  { %2730 = vsyncadd [#allocation11], 4294963200  ;;  %v2835_v0 = vld [vmem:[#allocation4] sm:$0xff]  ;;  %v2837_v1 = vld [vmem:[#allocation4 + $0x8] sm:$0xff]  ;;  %s2741_s10 = smov [#allocation12]  }
  0x4b   :  { %v2839_v2 = vld [vmem:[#allocation4 + $0x10] sm:$0xff]  ;;  %v2841_v3 = vld [vmem:[#allocation4 + $0x18] sm:$0xff]  ;;  %v87_v4 = vadd.f32 %v2837_v1, %v2835_v0  ;;  %v2845_v5 = vld [vmem:[#allocation4 + $0x20] sm:$0xff]  ;;  %s1984_s11 = sshll.u32 %s2741_s10, 4  ;;  %s1985_s11 = int_to_ptr.vmem [resolvable:$true] %s1984_s11 }
  0x4c   :  { %v2848_v7 = vld [vmem:[#allocation4 + $0x28] sm:$0xff]  ;;  %v2295_v12 = vld [vmem:[#allocation9 + $0xc] ss:$16 sps:$4 sm:$0xff]   ;;  %s2703_s12 = scalar_lea.vmem %s1985_s11, 128  ;;  %p2708_p5 = scmp.lt.s32.totalorder %s1985_s11, %s1985_s11 }
  0x4d   :  { %v88_v6 = vadd.f32 %v87_v4, %v2839_v2  ;;  %v2293_v11 = vld [vmem:[#allocation9 + $0x4] ss:$16 sps:$4 sm:$0xff]   ;;  %v2297_v13 = vld [vmem:[#allocation9] ss:$16 sps:$4 sm:$0xff]   ;;  %v2298_v14 = vld [vmem:[#allocation9 + $0x8] ss:$16 sps:$4 sm:$0xff]   ;;  %1503 = vmatprep.subr.bf16.mxu1 %v2295_v12  ;;  %p2704_p4 = scmp.ne.s32.totalorder %s1985_s11, %s2703_s12  ;;  %p2709_p6 = scmp.lt.s32.totalorder %s2703_s12, %s2703_s12 }
  0x4e   :  { %v2299_v15 = vld [vmem:[#allocation9 + $0x24] ss:$16 sps:$4 sm:$0xff]   ;;  %v2301_v16 = vld [vmem:[#allocation9 + $0x2c] ss:$16 sps:$4 sm:$0xff]   ;;  %1380 = vmatprep.subr.bf16.mxu0 %v2293_v11  ;;  %1504 = vmatpush1.bf16.msra.mxu1 %v2298_v14  ;;  %v2303_v17 = vld [vmem:[#allocation9 + $0x20] ss:$16 sps:$4 sm:$0xff]  }
  0x4f   :  { %v89_v8 = vadd.f32 %v88_v6, %v2841_v3  ;;  %1381 = vmatpush1.bf16.msra.mxu0 %v2297_v13  ;;  %v2304_v18 = vld [vmem:[#allocation9 + $0x28] ss:$16 sps:$4 sm:$0xff]   ;;  %1505 = vmatprep.subr.bf16.mxu1 %v2301_v16  ;;  %v2305_v19 = vld [vmem:[#allocation9 + $0x44] ss:$16 sps:$4 sm:$0xff]   ;;  %v2307_v20 = vld [vmem:[#allocation9 + $0x4c] ss:$16 sps:$4 sm:$0xff]   ;;  %p2710_p7 = por %p2709_p6, %p2708_p5 }
  0x50   :  { %1382 = vmatprep.subr.bf16.mxu0 %v2299_v15  ;;  %v2309_v21 = vld [vmem:[#allocation9 + $0x40] ss:$16 sps:$4 sm:$0xff]   ;;  %v2310_v22 = vld [vmem:[#allocation9 + $0x48] ss:$16 sps:$4 sm:$0xff]   ;;  %v2311_v23 = vld [vmem:[#allocation9 + $0x64] ss:$16 sps:$4 sm:$0xff]  }
  0x51   :  { %v90_v9 = vadd.f32 %v89_v8, %v2845_v5  ;;  %v2313_v24 = vld [vmem:[#allocation9 + $0x6c] ss:$16 sps:$4 sm:$0xff]   ;;  %v2315_v25 = vld [vmem:[#allocation9 + $0x60] ss:$16 sps:$4 sm:$0xff]   ;;  %v2316_v26 = vld [vmem:[#allocation9 + $0x68] ss:$16 sps:$4 sm:$0xff]   ;;  %p2711_p8 = pnand %p2710_p7, %p2704_p4 }
  0x52   :  { %1506 = vmatpush1.bf16.msra.mxu1 %v2304_v18  ;;  %v2317_v27 = vld [vmem:[#allocation9 + $0x84] ss:$16 sps:$4 sm:$0xff]   ;;  %v2319_v28 = vld [vmem:[#allocation9 + $0x8c] ss:$16 sps:$4 sm:$0xff]   ;;  %v2321_v29 = vld [vmem:[#allocation9 + $0x80] ss:$16 sps:$4 sm:$0xff]  }
  0x53   :  { %v91_v10 = vadd.f32 %v90_v9, %v2848_v7  ;;  %1383 = vmatpush1.bf16.msra.mxu0 %v2303_v17  ;;  %1507 = vmatprep.subr.bf16.mxu1 %v2307_v20  ;;  %v2322_v30 = vld [vmem:[#allocation9 + $0x88] ss:$16 sps:$4 sm:$0xff]   ;;  %v2323_v31 = vld [vmem:[#allocation9 + $0xa4] ss:$16 sps:$4 sm:$0xff]   ;;  %v2325_v32 = vld [vmem:[#allocation9 + $0xac] ss:$16 sps:$4 sm:$0xff]  }
  0x54   :  { %1384 = vmatprep.subr.bf16.mxu0 %v2305_v19  ;;  %v2327_v33 = vld [vmem:[#allocation9 + $0xa0] ss:$16 sps:$4 sm:$0xff]   ;;  %v2328_v34 = vld [vmem:[#allocation9 + $0xa8] ss:$16 sps:$4 sm:$0xff]   ;;  %v2329_v35 = vld [vmem:[#allocation9 + $0xc4] ss:$16 sps:$4 sm:$0xff]  }
  0x55   :  { %92 = vadd.xlane.f32.xlu0 %v91_v10  ;;  %v2331_v36 = vld [vmem:[#allocation9 + $0xcc] ss:$16 sps:$4 sm:$0xff]   ;;  %v2333_v37 = vld [vmem:[#allocation9 + $0xc0] ss:$16 sps:$4 sm:$0xff]   ;;  %v2334_v38 = vld [vmem:[#allocation9 + $0xc8] ss:$16 sps:$4 sm:$0xff]  }
  0x56   :  { %1508 = vmatpush1.bf16.msra.mxu1 %v2310_v22  ;;  %v2335_v39 = vld [vmem:[#allocation9 + $0xe4] ss:$16 sps:$4 sm:$0xff]   ;;  %v2337_v40 = vld [vmem:[#allocation9 + $0xec] ss:$16 sps:$4 sm:$0xff]   ;;  %v2339_v41 = vld [vmem:[#allocation9 + $0xe0] ss:$16 sps:$4 sm:$0xff]  }
  0x57   :  { %1385 = vmatpush1.bf16.msra.mxu0 %v2309_v21  ;;  %1509 = vmatprep.subr.bf16.mxu1 %v2313_v24  ;;  %v2340_v42 = vld [vmem:[#allocation9 + $0xe8] ss:$16 sps:$4 sm:$0xff]   ;;  %v2341_v43 = vld [vmem:[#allocation9 + $0x104] ss:$16 sps:$4 sm:$0xff]   ;;  %v2343_v44 = vld [vmem:[#allocation9 + $0x10c] ss:$16 sps:$4 sm:$0xff]   ;;  %v126_v24 = vlaneseq }
  0x58   :  { %1386 = vmatprep.subr.bf16.mxu0 %v2311_v23  ;;  %v2345_v45 = vld [vmem:[#allocation9 + $0x100] ss:$16 sps:$4 sm:$0xff]   ;;  %v2346_v46 = vld [vmem:[#allocation9 + $0x108] ss:$16 sps:$4 sm:$0xff]   ;;  %v2347_v47 = vld [vmem:[#allocation9 + $0x124] ss:$16 sps:$4 sm:$0xff]  }
  0x59   :  { %v2349_v48 = vld [vmem:[#allocation9 + $0x12c] ss:$16 sps:$4 sm:$0xff]   ;;  %v2351_v49 = vld [vmem:[#allocation9 + $0x120] ss:$16 sps:$4 sm:$0xff]   ;;  %v2352_v50 = vld [vmem:[#allocation9 + $0x128] ss:$16 sps:$4 sm:$0xff]  }
  0x5a   :  { %1510 = vmatpush1.bf16.msra.mxu1 %v2316_v26  ;;  %v2353_v51 = vld [vmem:[#allocation9 + $0x144] ss:$16 sps:$4 sm:$0xff]   ;;  %v2355_v52 = vld [vmem:[#allocation9 + $0x14c] ss:$16 sps:$4 sm:$0xff]   ;;  %v2357_v9 = vld [vmem:[#allocation9 + $0x140] ss:$16 sps:$4 sm:$0xff]  }
  0x5b   :  { %1387 = vmatpush1.bf16.msra.mxu0 %v2315_v25  ;;  %1511 = vmatprep.subr.bf16.mxu1 %v2319_v28  ;;  %v2358_v10 = vld [vmem:[#allocation9 + $0x148] ss:$16 sps:$4 sm:$0xff]   ;;  %v2361_v11 = vld [vmem:[#allocation9 + $0x16c] ss:$16 sps:$4 sm:$0xff]   ;;  %v2363_v12 = vld [vmem:[#allocation9 + $0x160] ss:$16 sps:$4 sm:$0xff]  }
  0x5c   :  { %1388 = vmatprep.subr.bf16.mxu0 %v2317_v27  ;;  %v2364_v13 = vld [vmem:[#allocation9 + $0x168] ss:$16 sps:$4 sm:$0xff]   ;;  %v2365_v14 = vld [vmem:[#allocation9 + $0x184] ss:$16 sps:$4 sm:$0xff]   ;;  %v2367_v15 = vld [vmem:[#allocation9 + $0x18c] ss:$16 sps:$4 sm:$0xff]  }
  0x5d   :  { %v2369_v16 = vld [vmem:[#allocation9 + $0x180] ss:$16 sps:$4 sm:$0xff]   ;;  %v2370_v17 = vld [vmem:[#allocation9 + $0x188] ss:$16 sps:$4 sm:$0xff]   ;;  %v2371_v18 = vld [vmem:[#allocation9 + $0x1a4] ss:$16 sps:$4 sm:$0xff]  }
  0x5e   :  { %1512 = vmatpush1.bf16.msra.mxu1 %v2322_v30  ;;  %v2373_v19 = vld [vmem:[#allocation9 + $0x1ac] ss:$16 sps:$4 sm:$0xff]   ;;  %v2375_v20 = vld [vmem:[#allocation9 + $0x1a0] ss:$16 sps:$4 sm:$0xff]   ;;  %v2376_v21 = vld [vmem:[#allocation9 + $0x1a8] ss:$16 sps:$4 sm:$0xff]  }
  0x5f   :  { %1389 = vmatpush1.bf16.msra.mxu0 %v2321_v29  ;;  %1513 = vmatprep.subr.bf16.mxu1 %v2325_v32  ;;  %v2377_v22 = vld [vmem:[#allocation9 + $0x1c4] ss:$16 sps:$4 sm:$0xff]   ;;  %v2379_v23 = vld [vmem:[#allocation9 + $0x1cc] ss:$16 sps:$4 sm:$0xff]   ;;  %v127_v25 = vshrl.u32 %v126_v24, 7 }
  0x60   :  { %1390 = vmatprep.subr.bf16.mxu0 %v2323_v31  ;;  %v2381_v26 = vld [vmem:[#allocation9 + $0x1c0] ss:$16 sps:$4 sm:$0xff]   ;;  %v2382_v27 = vld [vmem:[#allocation9 + $0x1c8] ss:$16 sps:$4 sm:$0xff]   ;;  %v2383_v28 = vld [vmem:[#allocation9 + $0x1e4] ss:$16 sps:$4 sm:$0xff]  }
  0x61   :  { %v2385_v29 = vld [vmem:[#allocation9 + $0x1ec] ss:$16 sps:$4 sm:$0xff]   ;;  %v148_v31 = vsub.s32 5, %v127_v25  ;;  %v144_v32 = vsub.s32 4, %v127_v25  ;;  %v2404_v24 = vld [vmem:[#allocation9 + $0x248] ss:$16 sps:$4 sm:$0xff]  }
  0x62   :  { %1514 = vmatpush1.bf16.msra.mxu1 %v2328_v34  ;;  %v124_v30 = vld [vmem:[%s2944_s2] sm:$0x3f] }
  0x63   :  { %1391 = vmatpush1.bf16.msra.mxu0 %v2327_v33  ;;  %1515 = vmatprep.subr.bf16.mxu1 %v2331_v36  ;;  %v2387_v33 = vld [vmem:[#allocation9 + $0x1e0] ss:$16 sps:$4 sm:$0xff]   ;;  %v2388_v34 = vld [vmem:[#allocation9 + $0x1e8] ss:$16 sps:$4 sm:$0xff]   ;;  %v149_v36 = vrot.slane %v124_v30, %v148_v31 }
  0x64   :  { %1392 = vmatprep.subr.bf16.mxu0 %v2329_v35  ;;  %v162_v35 = vld [vmem:[#allocation7] sm:$0x3f] }
  0x66   :  { %1516 = vmatpush1.bf16.msra.mxu1 %v2334_v38  ;;  %v187_v38 = vrot.slane %v162_v35, %v148_v31  ;;  %v2413_v31 = vld [vmem:[#allocation9 + $0x280] ss:$16 sps:$4 sm:$0xff]  }
  0x67   :  { %1393 = vmatpush1.bf16.msra.mxu0 %v2333_v37  ;;  %1517 = vmatprep.subr.bf16.mxu1 %v2337_v40  ;;  %v145_v37 = vrot.slane %v124_v30, %v144_v32  ;;  %v2391_v40 = vld [vmem:[#allocation9 + $0x204] ss:$16 sps:$4 sm:$0xff]  }
  0x68   :  { %1394 = vmatprep.subr.bf16.mxu0 %v2335_v39  ;;  %v183_v39 = vrot.slane %v162_v35, %v144_v32  ;;  %v2416_v32 = vld [vmem:[#allocation9 + $0x288] ss:$16 sps:$4 sm:$0xff]  }
  0x6a   :  { %1518 = vmatpush1.bf16.msra.mxu1 %v2340_v42 }
  0x6b   :  { %1395 = vmatpush1.bf16.msra.mxu0 %v2339_v41  ;;  %1519 = vmatprep.subr.bf16.mxu1 %v2343_v44  ;;  %v2394_v41 = vld [vmem:[#allocation9 + $0x20c] ss:$16 sps:$4 sm:$0xff]  }
  0x6c   :  { %1396 = vmatprep.subr.bf16.mxu0 %v2341_v43 }
  0x6e   :  { %1520 = vmatpush1.bf16.msra.mxu1 %v2346_v46  ;;  %v2888_v46 = vsub.s32 0, %v127_v25 }
  0x6f   :  { %1397 = vmatpush1.bf16.msra.mxu0 %v2345_v45  ;;  %1521 = vmatprep.subr.bf16.mxu1 %v2349_v48  ;;  %v2886_v45 = vsub.s32 1, %v127_v25  ;;  %v2892_v48 = vsub.s32 2, %v127_v25 }
  0x70   :  { %1398 = vmatprep.subr.bf16.mxu0 %v2347_v47  ;;  %v2890_v47 = vsub.s32 3, %v127_v25  ;;  %v2409_v25 = vld [vmem:[#allocation9 + $0x264] ss:$16 sps:$4 sm:$0xff]  }
  0x72   :  { %1522 = vmatpush1.bf16.msra.mxu1 %v2352_v50  ;;  %v129_v50 = vrot.slane %v124_v30, %v2888_v46 }
  0x73   :  { %1399 = vmatpush1.bf16.msra.mxu0 %v2351_v49  ;;  %1523 = vmatprep.subr.bf16.mxu1 %v2355_v52  ;;  %v133_v49 = vrot.slane %v124_v30, %v2886_v45  ;;  %v137_v52 = vrot.slane %v124_v30, %v2892_v48 }
  0x74   :  { %1400 = vmatprep.subr.bf16.mxu0 %v2353_v51  ;;  %v141_v51 = vrot.slane %v124_v30, %v2890_v47  ;;  %v2418_v30 = vld [vmem:[#allocation9 + $0x28c] ss:$16 sps:$4 sm:$0xff]  }
  0x76   :  { %1524 = vmatpush1.bf16.msra.mxu1 %v2358_v10 }
  0x77   :  { %1401 = vmatpush1.bf16.msra.mxu0 %v2357_v9  ;;  %1525 = vmatprep.subr.bf16.mxu1 %v2361_v11 }
  0x7a   :  { %1526 = vmatpush1.bf16.msra.mxu1 %v2364_v13 }
  0x7b   :  { %1527 = vmatprep.subr.bf16.mxu1 %v2367_v15  ;;  %v2389_v15 = vld [vmem:[#allocation9 + $0x200] ss:$16 sps:$4 sm:$0xff]  }
  0x7e   :  { %1528 = vmatpush1.bf16.msra.mxu1 %v2370_v17  ;;  %v2400_v17 = vld [vmem:[#allocation9 + $0x22c] ss:$16 sps:$4 sm:$0xff]  }
  0x7f   :  { %1529 = vmatprep.subr.bf16.mxu1 %v2373_v19  ;;  %v2395_v19 = vld [vmem:[#allocation9 + $0x220] ss:$16 sps:$4 sm:$0xff]  }
  0x82   :  { %1530 = vmatpush1.bf16.msra.mxu1 %v2376_v21  ;;  %v2403_v21 = vld [vmem:[#allocation9 + $0x244] ss:$16 sps:$4 sm:$0xff]  }
  0x83   :  { %1531 = vmatprep.subr.bf16.mxu1 %v2379_v23  ;;  %v2401_v23 = vld [vmem:[#allocation9 + $0x240] ss:$16 sps:$4 sm:$0xff]  }
  0x86   :  { %1532 = vmatpush1.bf16.msra.mxu1 %v2382_v27  ;;  %v2407_v27 = vld [vmem:[#allocation9 + $0x260] ss:$16 sps:$4 sm:$0xff]  }
  0x87   :  { %1533 = vmatprep.subr.bf16.mxu1 %v2385_v29  ;;  %v2415_v29 = vld [vmem:[#allocation9 + $0x284] ss:$16 sps:$4 sm:$0xff]  }
  0x8a   :  { %1534 = vmatpush1.bf16.msra.mxu1 %v2388_v34  ;;  %v2424_v34 = vld [vmem:[#allocation9 + $0x2ac] ss:$16 sps:$4 sm:$0xff]  }
  0x8b   :  { %1544 = vmatprep.subr.bf16.mxu1 %v2394_v41  ;;  %v2433_v41 = vld [vmem:[#allocation9 + $0x2e4] ss:$16 sps:$4 sm:$0xff]  }
  0xe2   :  { %v93_v53 = vpop.xlane.xlu0 %92 }
  0xe3   :  { %v95_v54 = vmul.f32 0.0013020834, %v93_v53 }
  0xe5   :  { %v2854_v55 = vsub.f32 %v2835_v0, %v95_v54  ;;  %v2857_v56 = vsub.f32 %v2837_v1, %v95_v54  ;;  %v2860_v57 = vsub.f32 %v2839_v2, %v95_v54  ;;  %v2863_v58 = vsub.f32 %v2841_v3, %v95_v54 }
  0xe6   :  { %v2870_v61 = vsub.f32 %v2845_v5, %v95_v54  ;;  %v2875_v0 = vsub.f32 %v2848_v7, %v95_v54  ;;  %v2359_v7 = vld [vmem:[#allocation9 + $0x164] ss:$16 sps:$4 sm:$0xff]   ;;  %v171_v54 = vrot.slane %v162_v35, %v2886_v45 }
  0xe7   :  { %v102_v59 = vmul.f32 %v2854_v55, %v2854_v55  ;;  %v103_v60 = vmul.f32 %v2857_v56, %v2857_v56  ;;  %v104_v62 = vmul.f32 %v2860_v57, %v2860_v57  ;;  %v105_v1 = vmul.f32 %v2863_v58, %v2863_v58  ;;  %1402 = vmatprep.subr.bf16.mxu0 %v2359_v7 }
  0xe8   :  { %v106_v3 = vmul.f32 %v2870_v61, %v2870_v61  ;;  %v107_v6 = vmul.f32 %v2875_v0, %v2875_v0  ;;  %1403 = vmatpush1.bf16.msra.mxu0 %v2363_v12 }
  0xe9   :  { %v108_v63 = vadd.f32 %v103_v60, %v102_v59  ;;  %1404 = vmatprep.subr.bf16.mxu0 %v2365_v14  ;;  %v167_v59 = vrot.slane %v162_v35, %v2888_v46  ;;  %v175_v60 = vrot.slane %v162_v35, %v2892_v48 }
  0xeb   :  { %v109_v2 = vadd.f32 %v108_v63, %v104_v62 }
  0xec   :  { %1405 = vmatpush1.bf16.msra.mxu0 %v2369_v16 }
  0xed   :  { %v110_v4 = vadd.f32 %v109_v2, %v105_v1  ;;  %1406 = vmatprep.subr.bf16.mxu0 %v2371_v18 }
  0xef   :  { %v111_v5 = vadd.f32 %v110_v4, %v106_v3  ;;  %v179_v3 = vrot.slane %v162_v35, %v2890_v47  ;;  %v2419_v35 = vld [vmem:[#allocation9 + $0x2a0] ss:$16 sps:$4 sm:$0xff]  }
  0xf0   :  { %1407 = vmatpush1.bf16.msra.mxu0 %v2375_v20  ;;  %v2398_v20 = vld [vmem:[#allocation9 + $0x228] ss:$16 sps:$4 sm:$0xff]  }
  0xf1   :  { %v112_v8 = vadd.f32 %v111_v5, %v107_v6  ;;  %1408 = vmatprep.subr.bf16.mxu0 %v2377_v22  ;;  %v2406_v22 = vld [vmem:[#allocation9 + $0x24c] ss:$16 sps:$4 sm:$0xff]  }
  0xf3   :  { %113 = vadd.xlane.f32.xlu0 %v112_v8 }
  0xf4   :  { %1409 = vmatpush1.bf16.msra.mxu0 %v2381_v26  ;;  %v2412_v26 = vld [vmem:[#allocation9 + $0x26c] ss:$16 sps:$4 sm:$0xff]  }
  0xf5   :  { %1410 = vmatprep.subr.bf16.mxu0 %v2383_v28  ;;  %v2410_v28 = vld [vmem:[#allocation9 + $0x268] ss:$16 sps:$4 sm:$0xff]  }
  0xf8   :  { %1411 = vmatpush1.bf16.msra.mxu0 %v2387_v33  ;;  %v2421_v33 = vld [vmem:[#allocation9 + $0x2a4] ss:$16 sps:$4 sm:$0xff]  }
  0xf9   :  { %1421 = vmatprep.subr.bf16.mxu0 %v2391_v40  ;;  %v2428_v40 = vld [vmem:[#allocation9 + $0x2c8] ss:$16 sps:$4 sm:$0xff]  }
 0x180   :  { %v114_v42 = vpop.xlane.xlu0 %113 }
 0x181   :  { %v115_v43 = vmul.f32 0.0013020834, %v114_v42  ;;  %v2436_v42 = vld [vmem:[#allocation9 + $0x2ec] ss:$16 sps:$4 sm:$0xff]  }
 0x183   :  { %v116_v44 = vadd.f32 1e-06, %v115_v43  ;;  %v2431_v43 = vld [vmem:[#allocation9 + $0x2e0] ss:$16 sps:$4 sm:$0xff]  }
 0x185   :  { %2613 = vrsqrt.f32 %v116_v44  ;;  %v2434_v44 = vld [vmem:[#allocation9 + $0x2e8] ss:$16 sps:$4 sm:$0xff]  }
 0x18f   :  { %v2614_v53 = vpop.eup %2613 }
 0x190   :  { %v119_v62 = vmul.f32 %v2614_v53, %v2857_v56  ;;  %v118_v63 = vmul.f32 %v2614_v53, %v2854_v55  ;;  %v121_v1 = vmul.f32 %v2614_v53, %v2863_v58  ;;  %v120_v2 = vmul.f32 %v2614_v53, %v2860_v57 }
 0x191   :  { %v123_v4 = vmul.f32 %v2614_v53, %v2875_v0  ;;  %v122_v6 = vmul.f32 %v2614_v53, %v2870_v61  ;;  %v2392_v0 = vld [vmem:[#allocation9 + $0x208] ss:$16 sps:$4 sm:$0xff]   ;;  %v2397_v61 = vld [vmem:[#allocation9 + $0x224] ss:$16 sps:$4 sm:$0xff]  }
 0x192   :  { %v157_v5 = vmul.f32 %v133_v49, %v119_v62  ;;  %v156_v8 = vmul.f32 %v129_v50, %v118_v63  ;;  %v159_v9 = vmul.f32 %v141_v51, %v121_v1  ;;  %v158_v10 = vmul.f32 %v137_v52, %v120_v2  ;;  %v2439_v49 = vld [vmem:[#allocation9 + $0x304] ss:$16 sps:$4 sm:$0xff]   ;;  %v2442_v50 = vld [vmem:[#allocation9 + $0x30c] ss:$16 sps:$4 sm:$0xff]   ;;  %v2437_v51 = vld [vmem:[#allocation9 + $0x300] ss:$16 sps:$4 sm:$0xff]  }
 0x193   :  { %v161_v7 = vmul.f32 %v149_v36, %v123_v4  ;;  %v160_v11 = vmul.f32 %v145_v37, %v122_v6  ;;  %v2422_v36 = vld [vmem:[#allocation9 + $0x2a8] ss:$16 sps:$4 sm:$0xff]   ;;  %v2427_v37 = vld [vmem:[#allocation9 + $0x2c4] ss:$16 sps:$4 sm:$0xff]   ;;  %v2454_v63 = vld [vmem:[#allocation9 + $0x34c] ss:$16 sps:$4 sm:$0xff]  }
 0x194   :  { %v195_v12 = vadd.f32 %v171_v54, %v157_v5  ;;  %v194_v56 = vadd.f32 %v167_v59, %v156_v8  ;;  %v2908_v13 = vadd.f32 %v175_v60, %v158_v10  ;;  %v197_v55 = vadd.f32 %v179_v3, %v159_v9  ;;  %v2440_v52 = vld [vmem:[#allocation9 + $0x308] ss:$16 sps:$4 sm:$0xff]   ;;  %v2445_v53 = vld [vmem:[#allocation9 + $0x324] ss:$16 sps:$4 sm:$0xff]   ;;  %v2448_v54 = vld [vmem:[#allocation9 + $0x32c] ss:$16 sps:$4 sm:$0xff]  }
 0x195   :  { %v2910_v58 = vadd.f32 %v187_v38, %v161_v7  ;;  %v2912_v57 = vadd.f32 %v183_v39, %v160_v11  ;;  %v2430_v38 = vld [vmem:[#allocation9 + $0x2cc] ss:$16 sps:$4 sm:$0xff]   ;;  %v2425_v39 = vld [vmem:[#allocation9 + $0x2c0] ss:$16 sps:$4 sm:$0xff]   ;;  %v2446_v60 = vld [vmem:[#allocation9 + $0x328] ss:$16 sps:$4 sm:$0xff]  }
 0x196   :  { %v201_v14 = vpack.c.bf16 %v195_v12, %v195_v12  ;;  %v200_v16 = vpack.c.bf16 %v194_v56, %v194_v56  ;;  %v203_v18 = vpack.c.bf16 %v197_v55, %v197_v55  ;;  %v2443_v59 = vld [vmem:[#allocation9 + $0x320] ss:$16 sps:$4 sm:$0xff]   ;;  %v2451_v62 = vld [vmem:[#allocation9 + $0x344] ss:$16 sps:$4 sm:$0xff]   ;;  %v2452_v2 = vld [vmem:[#allocation9 + $0x348] ss:$16 sps:$4 sm:$0xff]  }
 0x197   :  { %v2449_v1 = vld [vmem:[#allocation9 + $0x340] ss:$16 sps:$4 sm:$0xff]   ;;  %v2457_v3 = vld [vmem:[#allocation9 + $0x364] ss:$16 sps:$4 sm:$0xff]   ;;  %v2460_v4 = vld [vmem:[#allocation9 + $0x36c] ss:$16 sps:$4 sm:$0xff]  }
 0x198   :  { %1412 = vmatprep.mubr.bf16.mxu0 %v201_v14  ;;  %1535 = vmatprep.mubr.bf16.mxu1 %v201_v14  ;;  %v2455_v6 = vld [vmem:[#allocation9 + $0x360] ss:$16 sps:$4 sm:$0xff]   ;;  %v2458_v5 = vld [vmem:[#allocation9 + $0x368] ss:$16 sps:$4 sm:$0xff]   ;;  %v2463_v8 = vld [vmem:[#allocation9 + $0x384] ss:$16 sps:$4 sm:$0xff]  }
 0x199   :  { %1413 = vmatmul.mubr.bf16.vlgmr.msra.gmra.mrb[0].mxu0 %v200_v16  ;;  %1536 = vmatmul.mubr.bf16.vlgmr.msra.gmra.mrb[0].mxu1 %v200_v16  ;;  %v2466_v9 = vld [vmem:[#allocation9 + $0x38c] ss:$16 sps:$4 sm:$0xff]   ;;  %v2461_v10 = vld [vmem:[#allocation9 + $0x380] ss:$16 sps:$4 sm:$0xff]   ;;  %v2464_v7 = vld [vmem:[#allocation9 + $0x388] ss:$16 sps:$4 sm:$0xff]  }
 0x19a   :  { %1422 = vmatpush1.bf16.msra.mxu0 %v2389_v15  ;;  %1545 = vmatpush1.bf16.msra.mxu1 %v2392_v0  ;;  %v2469_v11 = vld [vmem:[#allocation9 + $0x3a4] ss:$16 sps:$4 sm:$0xff]   ;;  %v2472_v12 = vld [vmem:[#allocation9 + $0x3ac] ss:$16 sps:$4 sm:$0xff]   ;;  %v2467_v56 = vld [vmem:[#allocation9 + $0x3a0] ss:$16 sps:$4 sm:$0xff]  }
 0x19b   :  { %1453 = vmatprep.mubr.bf16.mxu0 %v203_v18  ;;  %1576 = vmatprep.mubr.bf16.mxu1 %v203_v18  ;;  %v2470_v55 = vld [vmem:[#allocation9 + $0x3a8] ss:$16 sps:$4 sm:$0xff]   ;;  %v2475_v14 = vld [vmem:[#allocation9 + $0x3c4] ss:$16 sps:$4 sm:$0xff]   ;;  %v2478_v15 = vld [vmem:[#allocation9 + $0x3cc] ss:$16 sps:$4 sm:$0xff]  }
 0x19c   :  { %1423 = vmatprep.subr.bf16.mxu0 %v2397_v61  ;;  %1546 = vmatprep.subr.bf16.mxu1 %v2400_v17  ;;  %v2473_v0 = vld [vmem:[#allocation9 + $0x3c0] ss:$16 sps:$4 sm:$0xff]   ;;  %v2476_v16 = vld [vmem:[#allocation9 + $0x3c8] ss:$16 sps:$4 sm:$0xff]   ;;  %v2481_v61 = vld [vmem:[#allocation9 + $0x3e4] ss:$16 sps:$4 sm:$0xff]  }
 0x19d   :  { %v2484_v17 = vld [vmem:[#allocation9 + $0x3ec] ss:$16 sps:$4 sm:$0xff]   ;;  %v2479_v18 = vld [vmem:[#allocation9 + $0x3e0] ss:$16 sps:$4 sm:$0xff]  }
 0x19e   :  { %1424 = vmatpush1.bf16.msra.mxu0 %v2395_v19  ;;  %1547 = vmatpush1.bf16.msra.mxu1 %v2398_v20  ;;  %v2482_v19 = vld [vmem:[#allocation9 + $0x3e8] ss:$16 sps:$4 sm:$0xff]   ;;  %v2487_v20 = vld [vmem:[#allocation9 + $0x404] ss:$16 sps:$4 sm:$0xff]  }
 0x19f   :  { %1425 = vmatprep.subr.bf16.mxu0 %v2403_v21  ;;  %1548 = vmatprep.subr.bf16.mxu1 %v2406_v22  ;;  %v2490_v21 = vld [vmem:[#allocation9 + $0x40c] ss:$16 sps:$4 sm:$0xff]   ;;  %v2485_v22 = vld [vmem:[#allocation9 + $0x400] ss:$16 sps:$4 sm:$0xff]  }
 0x1a2   :  { %1426 = vmatpush1.bf16.msra.mxu0 %v2401_v23  ;;  %1549 = vmatpush1.bf16.msra.mxu1 %v2404_v24  ;;  %v202_v23 = vpack.c.bf16 %v2908_v13, %v2908_v13  ;;  %v2488_v24 = vld [vmem:[#allocation9 + $0x408] ss:$16 sps:$4 sm:$0xff]   ;;  %v2502_v13 = vld [vmem:[#allocation9 + $0x44c] ss:$16 sps:$4 sm:$0xff]  }
 0x1a3   :  { %1427 = vmatprep.subr.bf16.mxu0 %v2409_v25  ;;  %1550 = vmatprep.subr.bf16.mxu1 %v2412_v26  ;;  %v205_v25 = vpack.c.bf16 %v2910_v58, %v2910_v58  ;;  %v2493_v26 = vld [vmem:[#allocation9 + $0x424] ss:$16 sps:$4 sm:$0xff]  }
 0x1a4   :  { %v2505_v58 = vld [vmem:[#allocation9 + $0x464] ss:$16 sps:$4 sm:$0xff]  }
 0x1a6   :  { %1428 = vmatpush1.bf16.msra.mxu0 %v2407_v27  ;;  %1551 = vmatpush1.bf16.msra.mxu1 %v2410_v28  ;;  %v2496_v27 = vld [vmem:[#allocation9 + $0x42c] ss:$16 sps:$4 sm:$0xff]   ;;  %v2491_v28 = vld [vmem:[#allocation9 + $0x420] ss:$16 sps:$4 sm:$0xff]  }
 0x1a7   :  { %1429 = vmatprep.subr.bf16.mxu0 %v2415_v29  ;;  %1552 = vmatprep.subr.bf16.mxu1 %v2418_v30  ;;  %v2494_v29 = vld [vmem:[#allocation9 + $0x428] ss:$16 sps:$4 sm:$0xff]   ;;  %v2499_v30 = vld [vmem:[#allocation9 + $0x444] ss:$16 sps:$4 sm:$0xff]  }
 0x1aa   :  { %1430 = vmatpush1.bf16.msra.mxu0 %v2413_v31  ;;  %1553 = vmatpush1.bf16.msra.mxu1 %v2416_v32  ;;  %v2497_v31 = vld [vmem:[#allocation9 + $0x440] ss:$16 sps:$4 sm:$0xff]   ;;  %v2500_v32 = vld [vmem:[#allocation9 + $0x448] ss:$16 sps:$4 sm:$0xff]  }
 0x1ab   :  { %1431 = vmatprep.subr.bf16.mxu0 %v2421_v33  ;;  %1554 = vmatprep.subr.bf16.mxu1 %v2424_v34  ;;  %v2508_v33 = vld [vmem:[#allocation9 + $0x46c] ss:$16 sps:$4 sm:$0xff]   ;;  %v2503_v34 = vld [vmem:[#allocation9 + $0x460] ss:$16 sps:$4 sm:$0xff]  }
 0x1ae   :  { %1432 = vmatpush1.bf16.msra.mxu0 %v2419_v35  ;;  %1555 = vmatpush1.bf16.msra.mxu1 %v2422_v36  ;;  %v2506_v35 = vld [vmem:[#allocation9 + $0x468] ss:$16 sps:$4 sm:$0xff]   ;;  %v2511_v36 = vld [vmem:[#allocation9 + $0x484] ss:$16 sps:$4 sm:$0xff]  }
 0x1af   :  { %1433 = vmatprep.subr.bf16.mxu0 %v2427_v37  ;;  %1556 = vmatprep.subr.bf16.mxu1 %v2430_v38  ;;  %v2514_v37 = vld [vmem:[#allocation9 + $0x48c] ss:$16 sps:$4 sm:$0xff]   ;;  %v2509_v38 = vld [vmem:[#allocation9 + $0x480] ss:$16 sps:$4 sm:$0xff]  }
 0x1b2   :  { %1434 = vmatpush1.bf16.msra.mxu0 %v2425_v39  ;;  %1557 = vmatpush1.bf16.msra.mxu1 %v2428_v40  ;;  %v2512_v39 = vld [vmem:[#allocation9 + $0x488] ss:$16 sps:$4 sm:$0xff]   ;;  %v2517_v40 = vld [vmem:[#allocation9 + $0x4a4] ss:$16 sps:$4 sm:$0xff]  }
 0x1b3   :  { %1435 = vmatprep.subr.bf16.mxu0 %v2433_v41  ;;  %1558 = vmatprep.subr.bf16.mxu1 %v2436_v42  ;;  %v2520_v41 = vld [vmem:[#allocation9 + $0x4ac] ss:$16 sps:$4 sm:$0xff]   ;;  %v2515_v42 = vld [vmem:[#allocation9 + $0x4a0] ss:$16 sps:$4 sm:$0xff]  }
 0x1b6   :  { %1436 = vmatpush1.bf16.msra.mxu0 %v2431_v43  ;;  %1559 = vmatpush1.bf16.msra.mxu1 %v2434_v44  ;;  %v2518_v43 = vld [vmem:[#allocation9 + $0x4a8] ss:$16 sps:$4 sm:$0xff]   ;;  %v2523_v44 = vld [vmem:[#allocation9 + $0x4c4] ss:$16 sps:$4 sm:$0xff]  }
 0x1b7   :  { %1437 = vmatprep.subr.bf16.mxu0 %v2439_v49  ;;  %1560 = vmatprep.subr.bf16.mxu1 %v2442_v50  ;;  %v2526_v49 = vld [vmem:[#allocation9 + $0x4cc] ss:$16 sps:$4 sm:$0xff]   ;;  %v2521_v50 = vld [vmem:[#allocation9 + $0x4c0] ss:$16 sps:$4 sm:$0xff]  }
 0x1ba   :  { %1438 = vmatpush1.bf16.msra.mxu0 %v2437_v51  ;;  %1561 = vmatpush1.bf16.msra.mxu1 %v2440_v52  ;;  %v2524_v51 = vld [vmem:[#allocation9 + $0x4c8] ss:$16 sps:$4 sm:$0xff]   ;;  %v2529_v52 = vld [vmem:[#allocation9 + $0x4e4] ss:$16 sps:$4 sm:$0xff]  }
 0x1bb   :  { %1439 = vmatprep.subr.bf16.mxu0 %v2445_v53  ;;  %1562 = vmatprep.subr.bf16.mxu1 %v2448_v54  ;;  %v2532_v53 = vld [vmem:[#allocation9 + $0x4ec] ss:$16 sps:$4 sm:$0xff]   ;;  %v2527_v54 = vld [vmem:[#allocation9 + $0x4e0] ss:$16 sps:$4 sm:$0xff]  }
 0x1be   :  { %1440 = vmatpush1.bf16.msra.mxu0 %v2443_v59  ;;  %1563 = vmatpush1.bf16.msra.mxu1 %v2446_v60  ;;  %v2530_v59 = vld [vmem:[#allocation9 + $0x4e8] ss:$16 sps:$4 sm:$0xff]   ;;  %v2535_v60 = vld [vmem:[#allocation9 + $0x504] ss:$16 sps:$4 sm:$0xff]  }
 0x1bf   :  { %1441 = vmatprep.subr.bf16.mxu0 %v2451_v62  ;;  %1564 = vmatprep.subr.bf16.mxu1 %v2454_v63  ;;  %v2538_v62 = vld [vmem:[#allocation9 + $0x50c] ss:$16 sps:$4 sm:$0xff]   ;;  %v2533_v63 = vld [vmem:[#allocation9 + $0x500] ss:$16 sps:$4 sm:$0xff]  }
 0x1c2   :  { %1442 = vmatpush1.bf16.msra.mxu0 %v2449_v1  ;;  %1565 = vmatpush1.bf16.msra.mxu1 %v2452_v2  ;;  %v2536_v1 = vld [vmem:[#allocation9 + $0x508] ss:$16 sps:$4 sm:$0xff]   ;;  %v2541_v2 = vld [vmem:[#allocation9 + $0x524] ss:$16 sps:$4 sm:$0xff]  }
 0x1c3   :  { %1443 = vmatprep.subr.bf16.mxu0 %v2457_v3  ;;  %1566 = vmatprep.subr.bf16.mxu1 %v2460_v4  ;;  %v2544_v3 = vld [vmem:[#allocation9 + $0x52c] ss:$16 sps:$4 sm:$0xff]   ;;  %v2539_v4 = vld [vmem:[#allocation9 + $0x520] ss:$16 sps:$4 sm:$0xff]  }
 0x1c6   :  { %1444 = vmatpush1.bf16.msra.mxu0 %v2455_v6  ;;  %1567 = vmatpush1.bf16.msra.mxu1 %v2458_v5  ;;  %v2542_v6 = vld [vmem:[#allocation9 + $0x528] ss:$16 sps:$4 sm:$0xff]   ;;  %v2547_v5 = vld [vmem:[#allocation9 + $0x544] ss:$16 sps:$4 sm:$0xff]  }
 0x1c7   :  { %1445 = vmatprep.subr.bf16.mxu0 %v2463_v8  ;;  %1568 = vmatprep.subr.bf16.mxu1 %v2466_v9  ;;  %v2550_v8 = vld [vmem:[#allocation9 + $0x54c] ss:$16 sps:$4 sm:$0xff]   ;;  %v2545_v9 = vld [vmem:[#allocation9 + $0x540] ss:$16 sps:$4 sm:$0xff]  }
 0x1ca   :  { %1446 = vmatpush1.bf16.msra.mxu0 %v2461_v10  ;;  %1569 = vmatpush1.bf16.msra.mxu1 %v2464_v7  ;;  %v2548_v10 = vld [vmem:[#allocation9 + $0x548] ss:$16 sps:$4 sm:$0xff]   ;;  %v2553_v7 = vld [vmem:[#allocation9 + $0x564] ss:$16 sps:$4 sm:$0xff]  }
 0x1cb   :  { %1447 = vmatprep.subr.bf16.mxu0 %v2469_v11  ;;  %1570 = vmatprep.subr.bf16.mxu1 %v2472_v12  ;;  %v2556_v11 = vld [vmem:[#allocation9 + $0x56c] ss:$16 sps:$4 sm:$0xff]   ;;  %v2551_v12 = vld [vmem:[#allocation9 + $0x560] ss:$16 sps:$4 sm:$0xff]  }
 0x1ce   :  { %1448 = vmatpush1.bf16.msra.mxu0 %v2467_v56  ;;  %1571 = vmatpush1.bf16.msra.mxu1 %v2470_v55  ;;  %v2554_v56 = vld [vmem:[#allocation9 + $0x568] ss:$16 sps:$4 sm:$0xff]   ;;  %v2559_v55 = vld [vmem:[#allocation9 + $0x584] ss:$16 sps:$4 sm:$0xff]  }
 0x1cf   :  { %1449 = vmatprep.subr.bf16.mxu0 %v2475_v14  ;;  %1572 = vmatprep.subr.bf16.mxu1 %v2478_v15  ;;  %v2562_v14 = vld [vmem:[#allocation9 + $0x58c] ss:$16 sps:$4 sm:$0xff]   ;;  %v2557_v15 = vld [vmem:[#allocation9 + $0x580] ss:$16 sps:$4 sm:$0xff]  }
 0x1d2   :  { %1450 = vmatpush1.bf16.msra.mxu0 %v2473_v0  ;;  %1573 = vmatpush1.bf16.msra.mxu1 %v2476_v16  ;;  %v2560_v0 = vld [vmem:[#allocation9 + $0x588] ss:$16 sps:$4 sm:$0xff]   ;;  %v2565_v16 = vld [vmem:[#allocation9 + $0x5a4] ss:$16 sps:$4 sm:$0xff]  }
 0x1d3   :  { %1451 = vmatprep.subr.bf16.mxu0 %v2481_v61  ;;  %1574 = vmatprep.subr.bf16.mxu1 %v2484_v17  ;;  %v2568_v61 = vld [vmem:[#allocation9 + $0x5ac] ss:$16 sps:$4 sm:$0xff]   ;;  %v2563_v17 = vld [vmem:[#allocation9 + $0x5a0] ss:$16 sps:$4 sm:$0xff]  }
 0x1d6   :  { %1452 = vmatpush1.bf16.msra.mxu0 %v2479_v18  ;;  %1575 = vmatpush1.bf16.msra.mxu1 %v2482_v19  ;;  %v2566_v18 = vld [vmem:[#allocation9 + $0x5a8] ss:$16 sps:$4 sm:$0xff]   ;;  %v2571_v19 = vld [vmem:[#allocation9 + $0x5c4] ss:$16 sps:$4 sm:$0xff]  }
 0x1d7   :  { %1462 = vmatprep.subr.bf16.mxu0 %v2487_v20  ;;  %1585 = vmatprep.subr.bf16.mxu1 %v2490_v21  ;;  %v2574_v20 = vld [vmem:[#allocation9 + $0x5cc] ss:$16 sps:$4 sm:$0xff]   ;;  %v2569_v21 = vld [vmem:[#allocation9 + $0x5c0] ss:$16 sps:$4 sm:$0xff]  }
 0x1d9   :  { %1454 = vmatmul.mubr.bf16.vlgmr.msra.gmra.mrb[0].mxu0 %v202_v23  ;;  %1577 = vmatmul.mubr.bf16.vlgmr.msra.gmra.mrb[0].mxu1 %v202_v23  ;;  %v2577_v23 = vld [vmem:[#allocation9 + $0x5e4] ss:$16 sps:$4 sm:$0xff]  }
 0x1da   :  { %1463 = vmatpush1.bf16.msra.mxu0 %v2485_v22  ;;  %1494 = vmatprep.mubr.bf16.mxu0 %v205_v25  ;;  %v2572_v22 = vld [vmem:[#allocation9 + $0x5c8] ss:$16 sps:$4 sm:$0xff]  }
 0x1db   :  { %1586 = vmatpush1.bf16.msra.mxu1 %v2488_v24  ;;  %1617 = vmatprep.mubr.bf16.mxu1 %v205_v25  ;;  %v2580_v24 = vld [vmem:[#allocation9 + $0x5ec] ss:$16 sps:$4 sm:$0xff]   ;;  %v2575_v25 = vld [vmem:[#allocation9 + $0x5e0] ss:$16 sps:$4 sm:$0xff]  }
 0x1dc   :  { %1464 = vmatprep.subr.bf16.mxu0 %v2493_v26  ;;  %1587 = vmatprep.subr.bf16.mxu1 %v2496_v27  ;;  %v2578_v26 = vld [vmem:[#allocation9 + $0x5e8] ss:$16 sps:$4 sm:$0xff]   ;;  %v2581_v27 = vld [vmem:[#allocation10 + $0x40] sm:$0xff]  }
 0x1de   :  { %1465 = vmatpush1.bf16.msra.mxu0 %v2491_v28  ;;  %v2582_v28 = vld [vmem:[#allocation10 + $0xc0] sm:$0xff]  }
 0x1df   :  { %1588 = vmatpush1.bf16.msra.mxu1 %v2494_v29  ;;  %1466 = vmatprep.subr.bf16.mxu0 %v2499_v30  ;;  %v2583_v29 = vld [vmem:[#allocation10] sm:$0xff]   ;;  %v204_v30 = vpack.c.bf16 %v2912_v57, %v2912_v57  ;;  %v2592_v57 = vld [vmem:[#allocation10 + $0x90] sm:$0xff]  }
 0x1e0   :  { %1589 = vmatprep.subr.bf16.mxu1 %v2502_v13  ;;  %v2584_v13 = vld [vmem:[#allocation10 + $0x80] sm:$0xff]  }
 0x1e2   :  { %1467 = vmatpush1.bf16.msra.mxu0 %v2497_v31  ;;  %v2585_v31 = vld [vmem:[#allocation10 + $0x48] sm:$0xff]  }
 0x1e3   :  { %1590 = vmatpush1.bf16.msra.mxu1 %v2500_v32  ;;  %1468 = vmatprep.subr.bf16.mxu0 %v2505_v58  ;;  %v2586_v32 = vld [vmem:[#allocation10 + $0xc8] sm:$0xff]  }
 0x1e4   :  { %1591 = vmatprep.subr.bf16.mxu1 %v2508_v33  ;;  %v2587_v58 = vld [vmem:[#allocation10 + $0x8] sm:$0xff]  }
 0x1e5   :  { %v2588_v33 = vld [vmem:[#allocation10 + $0x88] sm:$0xff]  }
 0x1e6   :  { %1469 = vmatpush1.bf16.msra.mxu0 %v2503_v34  ;;  %v2589_v34 = vld [vmem:[#allocation10 + $0x50] sm:$0xff]  }
 0x1e7   :  { %1592 = vmatpush1.bf16.msra.mxu1 %v2506_v35  ;;  %1470 = vmatprep.subr.bf16.mxu0 %v2511_v36  ;;  %v2590_v35 = vld [vmem:[#allocation10 + $0xd0] sm:$0xff]  }
 0x1e8   :  { %1593 = vmatprep.subr.bf16.mxu1 %v2514_v37  ;;  %v2591_v36 = vld [vmem:[#allocation10 + $0x10] sm:$0xff]   ;;  %v2593_v37 = vld [vmem:[#allocation10 + $0x58] sm:$0xff]  }
 0x1ea   :  { %1471 = vmatpush1.bf16.msra.mxu0 %v2509_v38  ;;  %v2594_v38 = vld [vmem:[#allocation10 + $0xd8] sm:$0xff]  }
 0x1eb   :  { %1594 = vmatpush1.bf16.msra.mxu1 %v2512_v39  ;;  %1472 = vmatprep.subr.bf16.mxu0 %v2517_v40  ;;  %v2595_v39 = vld [vmem:[#allocation10 + $0x18] sm:$0xff]  }
 0x1ec   :  { %1595 = vmatprep.subr.bf16.mxu1 %v2520_v41  ;;  %v2596_v40 = vld [vmem:[#allocation10 + $0x98] sm:$0xff]   ;;  %v2597_v41 = vld [vmem:[#allocation10 + $0x60] sm:$0xff]  }
 0x1ee   :  { %1473 = vmatpush1.bf16.msra.mxu0 %v2515_v42  ;;  %v2598_v42 = vld [vmem:[#allocation10 + $0xe0] sm:$0xff]  }
 0x1ef   :  { %1596 = vmatpush1.bf16.msra.mxu1 %v2518_v43  ;;  %1474 = vmatprep.subr.bf16.mxu0 %v2523_v44  ;;  %v2599_v43 = vld [vmem:[#allocation10 + $0x20] sm:$0xff]  }
 0x1f0   :  { %1597 = vmatprep.subr.bf16.mxu1 %v2526_v49  ;;  %v2600_v44 = vld [vmem:[#allocation10 + $0xa0] sm:$0xff]   ;;  %v2601_v49 = vld [vmem:[#allocation10 + $0x68] sm:$0xff]  }
 0x1f2   :  { %1475 = vmatpush1.bf16.msra.mxu0 %v2521_v50  ;;  %v2602_v50 = vld [vmem:[#allocation10 + $0xe8] sm:$0xff]  }
 0x1f3   :  { %1598 = vmatpush1.bf16.msra.mxu1 %v2524_v51  ;;  %1476 = vmatprep.subr.bf16.mxu0 %v2529_v52  ;;  %v2603_v51 = vld [vmem:[#allocation10 + $0x28] sm:$0xff]  }
 0x1f4   :  { %1599 = vmatprep.subr.bf16.mxu1 %v2532_v53  ;;  %v2604_v52 = vld [vmem:[#allocation10 + $0xa8] sm:$0xff]   ;;  %v2605_v53 = vld [vmem:[#allocation10 + $0x70] sm:$0xff]  }
 0x1f6   :  { %1477 = vmatpush1.bf16.msra.mxu0 %v2527_v54  ;;  %v2606_v54 = vld [vmem:[#allocation10 + $0xf0] sm:$0xff]  }
 0x1f7   :  { %1600 = vmatpush1.bf16.msra.mxu1 %v2530_v59  ;;  %1478 = vmatprep.subr.bf16.mxu0 %v2535_v60  ;;  %v2607_v59 = vld [vmem:[#allocation10 + $0x30] sm:$0xff]  }
 0x1f8   :  { %1601 = vmatprep.subr.bf16.mxu1 %v2538_v62  ;;  %v2608_v60 = vld [vmem:[#allocation10 + $0xb0] sm:$0xff]   ;;  %v2609_v62 = vld [vmem:[#allocation10 + $0x78] sm:$0xff]  }
 0x1fa   :  { %1479 = vmatpush1.bf16.msra.mxu0 %v2533_v63  ;;  %v2610_v63 = vld [vmem:[#allocation10 + $0xf8] sm:$0xff]  }
 0x1fb   :  { %1602 = vmatpush1.bf16.msra.mxu1 %v2536_v1  ;;  %1480 = vmatprep.subr.bf16.mxu0 %v2541_v2  ;;  %v2611_v1 = vld [vmem:[#allocation10 + $0x38] sm:$0xff]  }
 0x1fc   :  { %1603 = vmatprep.subr.bf16.mxu1 %v2544_v3  ;;  %v2612_v2 = vld [vmem:[#allocation10 + $0xb8] sm:$0xff]   ;;  %v398_v3 = vld [vmem:[%s2947_s5] sm:$0xf] }
 0x1fe   :  { %1481 = vmatpush1.bf16.msra.mxu0 %v2539_v4  ;;  %v403_v4 = vrot.slane %v398_v3, %v2888_v46 }
 0x1ff   :  { %1604 = vmatpush1.bf16.msra.mxu1 %v2542_v6  ;;  %1482 = vmatprep.subr.bf16.mxu0 %v2547_v5  ;;  %v411_v6 = vrot.slane %v398_v3, %v2892_v48  ;;  %v407_v5 = vrot.slane %v398_v3, %v2886_v45 }
 0x200   :  { %1605 = vmatprep.subr.bf16.mxu1 %v2550_v8  ;;  %v415_v8 = vrot.slane %v398_v3, %v2890_v47 }
 0x202   :  { %1483 = vmatpush1.bf16.msra.mxu0 %v2545_v9 }
 0x203   :  { %1606 = vmatpush1.bf16.msra.mxu1 %v2548_v10  ;;  %1484 = vmatprep.subr.bf16.mxu0 %v2553_v7 }
 0x204   :  { %1607 = vmatprep.subr.bf16.mxu1 %v2556_v11 }
 0x206   :  { %1485 = vmatpush1.bf16.msra.mxu0 %v2551_v12 }
 0x207   :  { %1608 = vmatpush1.bf16.msra.mxu1 %v2554_v56  ;;  %1486 = vmatprep.subr.bf16.mxu0 %v2559_v55 }
 0x208   :  { %1609 = vmatprep.subr.bf16.mxu1 %v2562_v14 }
 0x20a   :  { %1487 = vmatpush1.bf16.msra.mxu0 %v2557_v15 }
 0x20b   :  { %1610 = vmatpush1.bf16.msra.mxu1 %v2560_v0  ;;  %1488 = vmatprep.subr.bf16.mxu0 %v2565_v16 }
 0x20c   :  { %1611 = vmatprep.subr.bf16.mxu1 %v2568_v61 }
 0x20e   :  { %1489 = vmatpush1.bf16.msra.mxu0 %v2563_v17 }
 0x20f   :  { %1612 = vmatpush1.bf16.msra.mxu1 %v2566_v18  ;;  %1490 = vmatprep.subr.bf16.mxu0 %v2571_v19 }
 0x210   :  { %1613 = vmatprep.subr.bf16.mxu1 %v2574_v20 }
 0x212   :  { %1491 = vmatpush1.bf16.msra.mxu0 %v2569_v21 }
 0x213   :  { %1614 = vmatpush1.bf16.msra.mxu1 %v2572_v22  ;;  %1492 = vmatprep.subr.bf16.mxu0 %v2577_v23  ;;  %v2187_v23 = vld [vmem:[%s2949_s7] ss:$0 sm:$0xff] }
 0x214   :  { %1615 = vmatprep.subr.bf16.mxu1 %v2580_v24 }
 0x216   :  { %1493 = vmatpush1.bf16.msra.mxu0 %v2575_v25 }
 0x217   :  { %1616 = vmatpush1.bf16.msra.mxu1 %v2578_v26  ;;  %2220 = vmatprep.subr.bf16.mxu0 %v2581_v27 }
 0x218   :  { %2242 = vmatprep.subr.bf16.mxu1 %v2582_v28 }
 0x219   :  { %1495 = vmatmul.mubr.bf16.vlgmr.msra.gmra.mrb[0].mxu0 %v204_v30 }
 0x21a   :  { %1618 = vmatmul.mubr.bf16.vlgmr.msra.gmra.mrb[0].mxu1 %v204_v30  ;;  %2221 = vmatpush3.bf16.msra.mxu0 %v2583_v29 }
 0x21b   :  { %2243 = vmatpush3.bf16.msra.mxu1 %v2584_v13  ;;  %2222 = vmatprep.subr.bf16.mxu0 %v2585_v31 }
 0x21c   :  { %2244 = vmatprep.subr.bf16.mxu1 %v2586_v32 }
 0x21e   :  { %2223 = vmatpush3.bf16.msra.mxu0 %v2587_v58 }
 0x21f   :  { %2245 = vmatpush3.bf16.msra.mxu1 %v2588_v33  ;;  %2224 = vmatprep.subr.bf16.mxu0 %v2589_v34 }
 0x220   :  { %2246 = vmatprep.subr.bf16.mxu1 %v2590_v35 }
 0x222   :  { %2225 = vmatpush3.bf16.msra.mxu0 %v2591_v36 }
 0x223   :  { %2247 = vmatpush3.bf16.msra.mxu1 %v2592_v57  ;;  %2226 = vmatprep.subr.bf16.mxu0 %v2593_v37 }
 0x224   :  { %2248 = vmatprep.subr.bf16.mxu1 %v2594_v38 }
 0x226   :  { %2227 = vmatpush3.bf16.msra.mxu0 %v2595_v39 }
 0x227   :  { %2249 = vmatpush3.bf16.msra.mxu1 %v2596_v40  ;;  %2228 = vmatprep.subr.bf16.mxu0 %v2597_v41 }
 0x228   :  { %2250 = vmatprep.subr.bf16.mxu1 %v2598_v42 }
 0x22a   :  { %2229 = vmatpush3.bf16.msra.mxu0 %v2599_v43 }
 0x22b   :  { %2251 = vmatpush3.bf16.msra.mxu1 %v2600_v44  ;;  %2230 = vmatprep.subr.bf16.mxu0 %v2601_v49 }
 0x22c   :  { %2252 = vmatprep.subr.bf16.mxu1 %v2602_v50 }
 0x22e   :  { %2231 = vmatpush3.bf16.msra.mxu0 %v2603_v51 }
 0x22f   :  { %2253 = vmatpush3.bf16.msra.mxu1 %v2604_v52  ;;  %2232 = vmatprep.subr.bf16.mxu0 %v2605_v53 }
 0x230   :  { %2254 = vmatprep.subr.bf16.mxu1 %v2606_v54 }
 0x232   :  { %2233 = vmatpush3.bf16.msra.mxu0 %v2607_v59 }
 0x233   :  { %2255 = vmatpush3.bf16.msra.mxu1 %v2608_v60  ;;  %2234 = vmatprep.subr.bf16.mxu0 %v2609_v62 }
 0x234   :  { %2256 = vmatprep.subr.bf16.mxu1 %v2610_v63 }
 0x236   :  { %2235 = vmatpush3.bf16.msra.mxu0 %v2611_v1 }
 0x237   :  { %2257 = vmatpush3.bf16.msra.mxu1 %v2612_v2 }
 0x2ec   :  { %v1496_v9 = vpop.f32.mrb[0].mxu0 }
 0x2ed   :  { %v2264_v10 = vadd.f32 %v1496_v9, %v403_v4  ;;  %v1619_v7 = vpop.f32.mrb[0].mxu1  ;;  %v1498_v11 = vpop.f32.mrb[1].mxu0 }
 0x2ee   :  { %v2266_v12 = vadd.f32 %v1619_v7, %v411_v6  ;;  %v2265_v56 = vadd.f32 %v1498_v11, %v407_v5  ;;  %v1621_v55 = vpop.f32.mrb[1].mxu1  ;;  %v1500_v14 = vpop.f32.mrb[2].mxu0 }
 0x2ef   :  { %v1626_v15 = vmax.f32 %v2264_v10, 0.0  ;;  %v2267_v0 = vadd.f32 %v1621_v55, %v415_v8  ;;  %v1623_v16 = vpop.f32.mrb[2].mxu1  ;;  %v1501_v61 = vpop.f32.mrb[3].mxu0 }
 0x2f0   :  { %v1628_v17 = vmax.f32 %v2266_v12, 0.0  ;;  %v1627_v46 = vmax.f32 %v2265_v56, 0.0  ;;  %v1624_v18 = vpop.f32.mrb[3].mxu1 }
 0x2f1   :  { %v1629_v48 = vmax.f32 %v2267_v0, 0.0  ;;  %v1630_v45 = vpack.c.bf16 %v1626_v15, %v1626_v15 }
 0x2f2   :  { %v1631_v19 = vpack.c.bf16 %v1627_v46, %v1627_v46  ;;  %v1632_v47 = vpack.c.bf16 %v1628_v17, %v1628_v17 }
 0x2f3   :  { %v1633_v20 = vpack.c.bf16 %v1629_v48, %v1629_v48 }
 0x2f4   :  { %1929 = vmatprep.mubr.bf16.mxu0 %v1631_v19 }
 0x2f5   :  { %1969 = vmatprep.mubr.bf16.mxu1 %v1633_v20  ;;  %1930 = vmatmul.mubr.bf16.vlgmr.msra.gmra.mrb[4].mxu0 %v1630_v45 }
 0x2f6   :  { %1970 = vmatmul.mubr.bf16.vlgmr.msra.gmra.mrb[4].mxu1 %v1632_v47 }
 0x3c8   :  { %v2236_v21 = vpop.f32.mrb[4].mxu0 }
 0x3c9   :  { %v2258_v22 = vpop.f32.mrb[4].mxu1  ;;  %v2237_v24 = vpop.f32.mrb[5].mxu0 }
 0x3ca   :  { %v2238_v25 = vadd.f32 %v2237_v24, %v2236_v21  ;;  %v2259_v26 = vpop.f32.mrb[5].mxu1  ;;  %v2239_v27 = vpop.f32.mrb[6].mxu0 }
 0x3cb   :  { %v2260_v28 = vadd.f32 %v2259_v26, %v2258_v22  ;;  %v2261_v29 = vpop.f32.mrb[6].mxu1  ;;  %v2240_v30 = vpop.f32.mrb[7].mxu0 }
 0x3cc   :  { %v1932_v13 = vadd.f32 %v2238_v25, %v2187_v23  ;;  %v2262_v31 = vpop.f32.mrb[7].mxu1 }
 0x3ce   :  { %v1972_v32 = vadd.f32 %v2260_v28, %v1932_v13 }
 0x3d0   :  { %1977 = vst [vmem:[#allocation12] sm:$0xff] %v1972_v32 }
 0x3d1   :  { %2714 = shalt.err (!%p2711_p8)
}
 0x3d2   :  { %s2715_s14 = scalar_lea.hbm %s2950_s8, 128 }
 0x3d3   :  { %p2716_p9 = scmp.ne.s32.totalorder %s2950_s8, %s2715_s14  ;;  %p2719_p10 = scmp.lt.u32.totalorder %s2715_s14, %s2950_s8 }
 0x3d5   :  { %p2721_p11 = pnand %p2719_p10, %p2716_p9 }
 0x3d7   :  { %2724 = shalt.err (!%p2721_p11)
}
 0x3d8   :  { %1987 = dma.vmem_to_hbm [thread:$0]  %s1985_s11, 128, %s2950_s8, [#allocation6]  }
 0x3d9   :  { %2731 = dma.done.wait [#allocation6], 128  }
 0x3da   :  { %2732 = vsyncadd [#allocation6], 4294967168 }
 0x3db   :  { %1991 = vsyncpa [#allocation5], 1 }
 0x3dc   :  { %1992 = vsyncpa [#allocation8], 1 }
 0x3dd   :  { %1993 = vsyncpa [#allocation11], 1 }
 0x3de   :  { %1994 = vsyncpa [#allocation6], 1 }

</bundles_post_ra>
